<compile_context>
chip_gen: v6e
topology: v6e:2x2x1
jax: 0.10.0
libtpu: 0.0.40
codegen_flags: <defaults>
</compile_context>

<pallas_src>
import functools
import math

import jax
import jax.numpy as jnp
from jax import lax
from jax.experimental import pallas as pl
from jax.experimental.pallas import tpu as pltpu


# --------------------------------------------------------------------------- #
# Block sizing helpers                                                         #
# --------------------------------------------------------------------------- #

def _vmem_limit_bytes():
    """Per-generation scoped-VMEM cap with headroom below physical VMEM."""
    try:
        cap = int(pltpu.get_tpu_info().vmem_capacity_bytes)
    except Exception:  # conservative default (v7x physical VMEM = 64 MiB)
        cap = 64 * 1024 * 1024
    return int(min(cap * 3 // 4, 96 * 1024 * 1024))


def _target_block_bytes(vmem_limit):
    # ~2x double-buffered input + 2x output + f32 intermediates ~= 6-8 live blocks.
    return max(256 * 1024, min(vmem_limit // 12, 4 * 1024 * 1024))


def _choose_block(dim, unit, bytes_per_unit, target_bytes, min_steps=2):
    """Largest multiple of `unit` whose block fits the byte budget, keeping the grid
    at >= min_steps steps (software pipelining + v7x megacore) when dim is big enough."""
    if dim <= unit:
        return dim                       # full extent: always a legal block shape
    blk_units = max(1, target_bytes // max(1, bytes_per_unit))
    blk = min(blk_units * unit, (dim // unit) * unit)
    if dim >= min_steps * unit:
        blk = min(blk, max(unit, (dim // (min_steps * unit)) * unit))
    return max(unit, blk)


def _cost_estimate(nelems, nrows, itemsize):
    return pl.CostEstimate(
        flops=9 * nelems,                # sums, squares, fused affine
        transcendentals=nrows,           # one rsqrt per normalization group
        bytes_accessed=2 * nelems * itemsize,
    )


# --------------------------------------------------------------------------- #
# Kernels                                                                      #
# --------------------------------------------------------------------------- #

def _ln_rows_kernel(x_ref, w_ref, b_ref, o_ref, *, eps):
    # x_ref: (bm, C); w_ref / b_ref: (1, C).  Normalize each row over C.
    x = x_ref[...].astype(jnp.float32)
    c = x.shape[-1]
    s1 = jnp.sum(x, axis=-1, keepdims=True)
    s2 = jnp.sum(x * x, axis=-1, keepdims=True)
    mean = s1 * (1.0 / c)
    var = jnp.maximum(s2 * (1.0 / c) - mean * mean, 0.0)
    inv = lax.rsqrt(var + eps)
    w = w_ref[...].astype(jnp.float32)
    b = b_ref[...].astype(jnp.float32)
    scale = inv * w
    o_ref[...] = (x * scale + (b - mean * scale)).astype(o_ref.dtype)


def _ln_folded_kernel(x_ref, w_ref, b_ref, seg_ref, o_ref, *, c, eps):
    # x_ref: (bm, k*C) with k original rows folded into the lane dim (k*C == 128).
    # seg_ref: (k*C, k*C) block-diagonal ones; x @ seg gives per-segment sums already
    # broadcast to every lane of its segment -> the whole block stays lane-dense and
    # the reduction runs on the idle MXU instead of the XLU.
    x = x_ref[...].astype(jnp.float32)
    seg = seg_ref[...]
    s1 = jnp.dot(x, seg, preferred_element_type=jnp.float32,
                 precision=lax.Precision.HIGHEST)
    s2 = jnp.dot(x * x, seg, preferred_element_type=jnp.float32,
                 precision=lax.Precision.HIGHEST)
    mean = s1 * (1.0 / c)
    var = jnp.maximum(s2 * (1.0 / c) - mean * mean, 0.0)
    inv = lax.rsqrt(var + eps)
    w = w_ref[...].astype(jnp.float32)
    b = b_ref[...].astype(jnp.float32)
    scale = inv * w
    o_ref[...] = (x * scale + (b - mean * scale)).astype(o_ref.dtype)


def _ln_cfirst_kernel(x_ref, w_ref, b_ref, o_ref, *, eps):
    # x_ref: (1, C, bS) -- reduce over the sublane axis C; w_ref / b_ref: (C, 1).
    x = x_ref[...].astype(jnp.float32)
    c = x.shape[1]
    s1 = jnp.sum(x, axis=1, keepdims=True)
    s2 = jnp.sum(x * x, axis=1, keepdims=True)
    mean = s1 * (1.0 / c)
    var = jnp.maximum(s2 * (1.0 / c) - mean * mean, 0.0)
    inv = lax.rsqrt(var + eps)
    w = w_ref[...].astype(jnp.float32)
    b = b_ref[...].astype(jnp.float32)
    scale = inv * w                                   # (1, C, bS)
    o_ref[...] = (x * scale + (b - mean * scale)).astype(o_ref.dtype)


# --------------------------------------------------------------------------- #
# Wrappers                                                                     #
# --------------------------------------------------------------------------- #

def _ln_channels_last(x, weight, bias, eps):
    C = x.shape[-1]
    R = math.prod(x.shape[:-1]) if x.ndim > 1 else 1
    itemsize = jnp.dtype(x.dtype).itemsize
    vmem_limit = _vmem_limit_bytes()
    target = _target_block_bytes(vmem_limit)
    params = pltpu.CompilerParams(dimension_semantics=("parallel",),
                                  vmem_limit_bytes=vmem_limit)
    cost = _cost_estimate(R * C, R, itemsize)

    k = 128 // C if (0 < C < 128 and 128 % C == 0) else 1
    if k > 1 and R % k == 0:
        # Lane-dense folded path: k rows per 128-wide folded row.
        kc = k * C
        rf = R // k
        xf = x.reshape(rf, kc)
        wf = jnp.tile(weight.reshape(1, C), (1, k))
        bf = jnp.tile(bias.reshape(1, C), (1, k))
        seg_ids = jnp.arange(kc, dtype=jnp.int32) // C
        seg = (seg_ids[:, None] == seg_ids[None, :]).astype(jnp.float32)
        blk = _choose_block(rf, 8, 8 * kc * itemsize, target)
        y = pl.pallas_call(
            functools.partial(_ln_folded_kernel, c=C, eps=eps),
            out_shape=jax.ShapeDtypeStruct((rf, kc), x.dtype),
            grid_spec=pltpu.PrefetchScalarGridSpec(
                num_scalar_prefetch=0,
                grid=(pl.cdiv(rf, blk),),
                in_specs=[
                    pl.BlockSpec((blk, kc), lambda i: (i, 0)),
                    pl.BlockSpec((1, kc), lambda i: (0, 0)),
                    pl.BlockSpec((1, kc), lambda i: (0, 0)),
                    pl.BlockSpec((kc, kc), lambda i: (0, 0)),
                ],
                out_specs=pl.BlockSpec((blk, kc), lambda i: (i, 0)),
            ),
            compiler_params=params,
            cost_estimate=cost,
        )(xf, wf, bf, seg)
        return y.reshape(x.shape)

    # Plain path (C already lane-dense or does not divide 128).
    x2 = x.reshape(R, C)
    blk = _choose_block(R, 8, 8 * C * itemsize, target)
    y = pl.pallas_call(
        functools.partial(_ln_rows_kernel, eps=eps),
        out_shape=jax.ShapeDtypeStruct((R, C), x.dtype),
        grid_spec=pltpu.PrefetchScalarGridSpec(
            num_scalar_prefetch=0,
            grid=(pl.cdiv(R, blk),),
            in_specs=[
                pl.BlockSpec((blk, C), lambda i: (i, 0)),
                pl.BlockSpec((1, C), lambda i: (0, 0)),
                pl.BlockSpec((1, C), lambda i: (0, 0)),
            ],
            out_specs=pl.BlockSpec((blk, C), lambda i: (i, 0)),
        ),
        compiler_params=params,
        cost_estimate=cost,
    )(x2, weight.reshape(1, C), bias.reshape(1, C))
    return y.reshape(x.shape)


def _ln_channels_first(x, weight, bias, eps):
    # x: (N, C, *spatial); normalize over axis 1.  No transposes: spatial is flattened
    # into the lane dim and the kernel reduces over the sublane (C) axis.
    N, C = x.shape[0], x.shape[1]
    S = math.prod(x.shape[2:]) if x.ndim > 2 else 1
    x3 = x.reshape(N, C, S)
    itemsize = jnp.dtype(x.dtype).itemsize
    vmem_limit = _vmem_limit_bytes()
    target = _target_block_bytes(vmem_limit)
    blk_s = _choose_block(S, 128, 128 * C * itemsize, target)
    y = pl.pallas_call(
        functools.partial(_ln_cfirst_kernel, eps=eps),
        out_shape=jax.ShapeDtypeStruct((N, C, S), x.dtype),
        grid_spec=pltpu.PrefetchScalarGridSpec(
            num_scalar_prefetch=0,
            grid=(N, pl.cdiv(S, blk_s)),
            in_specs=[
                pl.BlockSpec((1, C, blk_s), lambda n, s: (n, 0, s)),
                pl.BlockSpec((C, 1), lambda n, s: (0, 0)),
                pl.BlockSpec((C, 1), lambda n, s: (0, 0)),
            ],
            out_specs=pl.BlockSpec((1, C, blk_s), lambda n, s: (n, 0, s)),
        ),
        compiler_params=pltpu.CompilerParams(
            dimension_semantics=("parallel", "parallel"),
            vmem_limit_bytes=vmem_limit),
        cost_estimate=_cost_estimate(N * C * S, N * S, itemsize),
    )(x3, weight.reshape(C, 1), bias.reshape(C, 1))
    return y.reshape(x.shape)


def layer_norm(x, weight, bias, eps=1e-6, data_format="channels_last"):
    # NOTE: eps default 1e-6 intentionally matches the ConvNeXt-style module spec
    # (torch.nn.LayerNorm default would be 1e-5).
    if data_format == "channels_last":
        C = x.shape[-1]
        assert weight.shape == (C,) and bias.shape == (C,)
        return _ln_channels_last(x, weight, bias, eps)
    elif data_format == "channels_first":
        C = x.shape[1]
        assert weight.shape == (C,) and bias.shape == (C,)
        return _ln_channels_first(x, weight, bias, eps)
    else:
        raise NotImplementedError


# --------------------------------------------------------------------------- #
# Pure-JAX references + smoke test                                             #
# --------------------------------------------------------------------------- #

def _ref_channels_last(x, w, b, eps):
    mean = jnp.mean(x, axis=-1, keepdims=True)
    var = jnp.mean((x - mean) ** 2, axis=-1, keepdims=True)
    return (x - mean) / jnp.sqrt(var + eps) * w + b


def _ref_channels_first(x, w, b, eps):
    u = jnp.mean(x, axis=1, keepdims=True)
    s = jnp.mean((x - u) ** 2, axis=1, keepdims=True)
    xn = (x - u) / jnp.sqrt(s + eps)
    shape = (1, -1) + (1,) * (x.ndim - 2)
    return w.reshape(shape) * xn + b.reshape(shape)


if __name__ == "__main__":
    key = jax.random.PRNGKey(0)
    keys = jax.random.split(key, 12)
    eps = 1e-6

    # ---- channels_last, C = 32 (< 128 -> lane-dense folded path) ----
    C = 32
    x = jax.random.normal(keys[0], (2, 8, 8, C), dtype=jnp.float32)
    w = 1.0 + 0.1 * jax.random.normal(keys[1], (C,), dtype=jnp.float32)
    b = 0.1 * jax.random.normal(keys[2], (C,), dtype=jnp.float32)
    y = layer_norm(x, w, b, eps, data_format="channels_last")
    jax.block_until_ready(y)
    assert jnp.allclose(y, _ref_channels_last(x, w, b, eps), atol=1e-4, rtol=1e-4), \
        "channels_last C=32 mismatch"

    # ---- channels_last, C = 256 (>= 128 -> plain path) ----
    C = 256
    x = jax.random.normal(keys[3], (4, 8, C), dtype=jnp.float32)
    w = 1.0 + 0.1 * jax.random.normal(keys[4], (C,), dtype=jnp.float32)
    b = 0.1 * jax.random.normal(keys[5], (C,), dtype=jnp.float32)
    y = layer_norm(x, w, b, eps, data_format="channels_last")
    jax.block_until_ready(y)
    assert jnp.allclose(y, _ref_channels_last(x, w, b, eps), atol=1e-4, rtol=1e-4), \
        "channels_last C=256 mismatch"

    # ---- channels_first, x = (N, C, H, W) as in the PyTorch module ----
    C = 16
    x = jax.random.normal(keys[6], (2, C, 8, 8), dtype=jnp.float32)
    w = 1.0 + 0.1 * jax.random.normal(keys[7], (C,), dtype=jnp.float32)
    b = 0.1 * jax.random.normal(keys[8], (C,), dtype=jnp.float32)
    y = layer_norm(x, w, b, eps, data_format="channels_first")
    jax.block_until_ready(y)
    assert jnp.allclose(y, _ref_channels_first(x, w, b, eps), atol=1e-4, rtol=1e-4), \
        "channels_first mismatch"

    # ---- channels_first with larger spatial (lane-tiled S, multi-step grid) ----
    C = 8
    x = jax.random.normal(keys[9], (1, C, 16, 32), dtype=jnp.float32)
    w = 1.0 + 0.1 * jax.random.normal(keys[10], (C,), dtype=jnp.float32)
    b = 0.1 * jax.random.normal(keys[11], (C,), dtype=jnp.float32)
    y = layer_norm(x, w, b, eps, data_format="channels_first")
    jax.block_until_ready(y)
    assert jnp.allclose(y, _ref_channels_first(x, w, b, eps), atol=1e-4, rtol=1e-4), \
        "channels_first large-S mismatch"

    print("KERNEL_OK")
</pallas_src>

<mosaic_0001>
module attributes {stable_mosaic.version = 11 : i64} {
  func.func @_ln_folded_kernel(%arg0: i32, %arg1: memref<16x128xf32, #tpu.memory_space<vmem>>, %arg2: memref<1x128xf32, #tpu.memory_space<vmem>>, %arg3: memref<1x128xf32, #tpu.memory_space<vmem>>, %arg4: memref<128x128xf32, #tpu.memory_space<vmem>>, %arg5: memref<16x128xf32, #tpu.memory_space<vmem>>) attributes {dimension_semantics = [#tpu.dimension_semantics<parallel>], iteration_bounds = array<i64: 2>, scalar_prefetch = 0 : i64, scratch_operands = 0 : i64, tpu.core_type = #tpu.core_type<tc>, window_params = [{transform_indices = @transform_0, window_bounds = array<i64: 16, 128>}, {pipeline_mode = #tpu.pipeline_mode<synchronous>, transform_indices = @transform_1, window_bounds = array<i64: 1, 128>}, {pipeline_mode = #tpu.pipeline_mode<synchronous>, transform_indices = @transform_2, window_bounds = array<i64: 1, 128>}, {pipeline_mode = #tpu.pipeline_mode<synchronous>, transform_indices = @transform_3, window_bounds = array<i64: 128, 128>}, {transform_indices = @transform_4, window_bounds = array<i64: 16, 128>}]} {
    %c0 = arith.constant 0 : index
    %c0_0 = arith.constant 0 : index
    %0 = vector.load %arg1[%c0, %c0_0] : memref<16x128xf32, #tpu.memory_space<vmem>>, vector<16x128xf32>
    %c0_1 = arith.constant 0 : index
    %c0_2 = arith.constant 0 : index
    %1 = vector.load %arg4[%c0_1, %c0_2] : memref<128x128xf32, #tpu.memory_space<vmem>>, vector<128x128xf32>
    %cst = arith.constant dense<0.000000e+00> : vector<16x128xf32>
    %2 = tpu.matmul %0, %1, %cst {dimension_numbers = #tpu.dot_dimension_numbers<[1], [0], [0], [1], [0, 0, 1, 1], [], []>, precision = #tpu.contract_precision<fp32>} : vector<16x128xf32>, vector<128x128xf32>, vector<16x128xf32> -> vector<16x128xf32>
    %3 = arith.mulf %0, %0 : vector<16x128xf32>
    %cst_3 = arith.constant dense<0.000000e+00> : vector<16x128xf32>
    %4 = tpu.matmul %3, %1, %cst_3 {dimension_numbers = #tpu.dot_dimension_numbers<[1], [0], [0], [1], [0, 0, 1, 1], [], []>, precision = #tpu.contract_precision<fp32>} : vector<16x128xf32>, vector<128x128xf32>, vector<16x128xf32> -> vector<16x128xf32>
    %cst_4 = arith.constant 3.125000e-02 : f32
    %5 = vector.broadcast %cst_4 : f32 to vector<16x128xf32>
    %6 = arith.mulf %2, %5 : vector<16x128xf32>
    %cst_5 = arith.constant 3.125000e-02 : f32
    %7 = vector.broadcast %cst_5 : f32 to vector<16x128xf32>
    %8 = arith.mulf %4, %7 : vector<16x128xf32>
    %9 = arith.mulf %6, %6 : vector<16x128xf32>
    %10 = arith.subf %8, %9 : vector<16x128xf32>
    %cst_6 = arith.constant 0.000000e+00 : f32
    %11 = vector.broadcast %cst_6 : f32 to vector<16x128xf32>
    %12 = arith.maximumf %10, %11 : vector<16x128xf32>
    %cst_7 = arith.constant 9.99999997E-7 : f32
    %13 = vector.broadcast %cst_7 : f32 to vector<16x128xf32>
    %14 = arith.addf %12, %13 : vector<16x128xf32>
    %15 = math.rsqrt %14 : vector<16x128xf32>
    %c0_8 = arith.constant 0 : index
    %c0_9 = arith.constant 0 : index
    %16 = vector.load %arg2[%c0_8, %c0_9] : memref<1x128xf32, #tpu.memory_space<vmem>>, vector<1x128xf32>
    %c0_10 = arith.constant 0 : index
    %c0_11 = arith.constant 0 : index
    %17 = vector.load %arg3[%c0_10, %c0_11] : memref<1x128xf32, #tpu.memory_space<vmem>>, vector<1x128xf32>
    %18 = vector.broadcast %16 : vector<1x128xf32> to vector<16x128xf32>
    %19 = arith.mulf %15, %18 : vector<16x128xf32>
    %20 = arith.mulf %0, %19 : vector<16x128xf32>
    %21 = arith.mulf %6, %19 : vector<16x128xf32>
    %22 = vector.broadcast %17 : vector<1x128xf32> to vector<16x128xf32>
    %23 = arith.subf %22, %21 : vector<16x128xf32>
    %24 = arith.addf %20, %23 : vector<16x128xf32>
    %c0_12 = arith.constant 0 : index
    %c0_13 = arith.constant 0 : index
    %25 = vector.load %arg5[%c0_12, %c0_13] : memref<16x128xf32, #tpu.memory_space<vmem>>, vector<16x128xf32>
    tpu.vector_store %arg5[%c0_12, %c0_13], %24 {strides = array<i32>} : memref<16x128xf32, #tpu.memory_space<vmem>>, vector<16x128xf32>,
    return
  }
  func.func @transform_0(%arg0: i32) -> (i32, i32) {
    %c0_i32 = arith.constant 0 : i32
    %c0_i32_0 = arith.constant 0 : i32
    return %arg0, %c0_i32 : i32, i32
  }
  func.func @transform_1(%arg0: i32) -> (i32, i32) {
    %c0_i32 = arith.constant 0 : i32
    %c0_i32_0 = arith.constant 0 : i32
    %c0_i32_1 = arith.constant 0 : i32
    return %c0_i32, %c0_i32_0 : i32, i32
  }
  func.func @transform_2(%arg0: i32) -> (i32, i32) {
    %c0_i32 = arith.constant 0 : i32
    %c0_i32_0 = arith.constant 0 : i32
    %c0_i32_1 = arith.constant 0 : i32
    return %c0_i32, %c0_i32_0 : i32, i32
  }
  func.func @transform_3(%arg0: i32) -> (i32, i32) {
    %c0_i32 = arith.constant 0 : i32
    %c0_i32_0 = arith.constant 0 : i32
    %c0_i32_1 = arith.constant 0 : i32
    return %c0_i32, %c0_i32_0 : i32, i32
  }
  func.func @transform_4(%arg0: i32) -> (i32, i32) {
    %c0_i32 = arith.constant 0 : i32
    %c0_i32_0 = arith.constant 0 : i32
    return %arg0, %c0_i32 : i32, i32
  }
}

</mosaic_0001>

<bundles_post_ra>
// kernel: tpu_custom_call.1
= control target key start
LH: loop header
LB: loop body
LE: loop exit
PB: predicated region body
PF: predicated region fallthrough
CT: control target
= control target key end

     0   :  { %9 = vsyncpa [#allocation3], 0  ;;  %s3484_s0 = inlined_call_operand.hbm [shape: f32[32,128], index: 0, kind: input, shape index: {}]   ;;  %s3485_s1 = inlined_call_operand.vmem [shape: f32[1,128], index: 1, kind: input, shape index: {}]   ;;  %s3486_s2 = inlined_call_operand.vmem [shape: f32[1,128], index: 2, kind: input, shape index: {}]   ;;  %s3487_s3 = inlined_call_operand.hbm [shape: f32[128,128], index: 3, kind: input, shape index: {}]   ;;  %s3488_s4 = inlined_call_operand.hbm [shape: f32[32,128], index: 4, kind: output, shape index: {}]  }
   0x1   :  { %11 = vsyncpa [#allocation3 + $0x1], 0 }
   0x2   :  { %12 = vsyncpa [#allocation6], 0 }
   0x3   :  { %13 = vsyncpa [#allocation4], 0 }
   0x4   :  { %15 = vsyncpa [#allocation4 + $0x1], 0  ;;  %s2637_s15 = smov 0   ;;  %s2639_s16 = smov 0  }
   0x5   :  { %s2641_s17 = smov 0   ;;  %s2643_s18 = smov 0  }
   0x6 LB: > { %s2658_s19 = sadd.s32 4294967295, %s2603_s18   ;;  %s1758_s20 = sadd.s32 4294967294, %s2603_s18   ;;  %s2603_s18 = sphi %s2643_s18, %s3560_s18   ;;  %s2599_s17 = sphi %s2641_s17, %s3559_s17   ;;  %s2595_s16 = sphi %s2639_s16, %s3558_s16   ;;  %s2591_s15 = sphi %s2637_s15, %s3557_s15  }
   0x7   : > { %p41_p0 = scmp.ne.s32.totalorder %s2595_s16, %s2591_s15  ;;  %p3489_p1 = scmp.eq.s32.totalorder %s2658_s19, 0 }
   0x8   : > { %p134_p3 = scmp.eq.s32.totalorder %s1758_s20, 1  ;;  %p1759_p5 = scmp.ge.s32.totalorder %s2603_s18, 1 }
   0x9   : > { %p2667_p4 = por %p3489_p1, %p41_p0  ;;  %p141_p7 = scmp.lt.s32.totalorder %s2603_s18, 3 }
   0xa   : > { %p2672_p6 = por %p134_p3, %p41_p0  ;;  %s2605_s24 = smov [#allocation5]  }
   0xb   : > { %s3515_s21 = scalar_select %p2667_p4, 1, 0 }
   0xc   : > { %s3516_s22 = scalar_select %p2672_p6, 1, 0 }
   0xd   : > { %p2677_p8 = pnand %p1759_p5, %p141_p7  ;;  %s159_s25 = sshll.u32 %s2605_s24, 4  ;;  %s160_s25 = int_to_ptr.vmem [resolvable:$true] %s159_s25 }
   0xe   : > { %s2691_s27 = sadd.s32 1, %s2603_s18   ;;  %s28_s28 = sadd.s32 1, %s2599_s17 }
   0xf   : > { %s3517_s23 = scalar_select %p2677_p8, 1, 0 }
  0x10   : > { %p2422_p9 = pneg %p2677_p8  ;;  %s25_s29 = ssub.s32 %s2603_s18, %s2691_s27 }
  0x11   : > { %s2492_s30 = scalar_lea.vmem %s160_s25, 2048  ;;  %p2500_p5 = scmp.lt.s32.totalorder %s160_s25, %s160_s25 }
  0x12   : > { %p2686_p11 = pnand %p2422_p9, %p3489_p1  ;;  %p2493_p13 = scmp.ne.s32.totalorder %s160_s25, %s2492_s30 }
  0x13   : > { %p2501_p7 = scmp.lt.s32.totalorder %s2492_s30, %s2492_s30 }
  0x14   : > { %p2483_p12 = pneg %p2686_p11 }
  0x15   : > { %p2502_p10 = por %p2501_p7, %p2500_p5 }
  0x16   : > { %p2495_p0 = pnand %p2493_p13, %p2483_p12 }
  0x18   : > { %p2496_p3 = pneg %p2495_p0 }
  0x1a   : > { %p2503_p2 = pnand %p2502_p10, %p2496_p3 }
  0x1c   : > { %2506 = shalt.err (!%p2503_p2)
}
  0x1d   : > { %s2606_s5 = smov 128   ;;  %s2607_s6 = smov 8  }
  0x1e   : > { %2425 = dma.hbm_to_vmem [thread:$0]  (!%p2686_p11), %s3487_s3, 2048, %s160_s25, [#allocation6], %s2606_s5, %s2606_s5, %s2607_s6  }
  0x1f   : > { %p26_p2 = scmp.eq.s32.totalorder %s25_s29, 0  ;;  %p35_p9 = scmp.ne.s32.totalorder %s2599_s17, %s2595_s16 }
  0x20   : > { %p36_p10 = scmp.eq.s32.totalorder %s2603_s18, 0  ;;  %p2435_p12 = scmp.lt.s32.totalorder %s2603_s18, 2 }
  0x21   : > { %s2711_s9 = scalar_select %p26_p2, %s2599_s17, %s28_s28  }
  0x22   : > { %p37_p13 = por %p36_p10, %p35_p9  ;;  %p3519_p0 = scmp.eq.s32.totalorder %s2658_s19, 1 }
  0x23   : > { %s173_s11 = sand.u32 1, %s2599_s17   ;;  %s1776_s12 = sshll.u32 %s2603_s18, 8 }
  0x24   : > { %p2715_p3 = por %p3519_p0, %p35_p9  ;;  %s1762_s13 = sshll.u32 %s173_s11, 4 }
  0x25   : > { %s2724_s24 = scalar_lea.hbm %s3484_s0, %s1776_s12  ;;  %s177_s25 = scalar_lea.vmem [#allocation2], %s1762_s13 }
  0x26   : > { %s3520_s10 = scalar_select %p2715_p3, 1, 0 }
  0x27   : > { %s184_s26 = sshll.u32 %s177_s25, 4  ;;  %p2726_p11 = pnand %p2435_p12, %p37_p13  ;;  %s2730_s26 = int_to_ptr.vmem [resolvable:$true] %s184_s26 }
  0x28   : > { %s2732_s29 = scalar_lea.sflag [#allocation3], %s173_s11  ;;  %s2507_s30 = scalar_lea.hbm %s2724_s24, 256 }
  0x29   : > { %p2508_p5 = scmp.ne.s32.totalorder %s2724_s24, %s2507_s30  ;;  %p2509_p7 = pneg %p2726_p11 }
  0x2a   : > { %s2512_s12 = scalar_lea.hbm %s3484_s0, 512  ;;  %p2513_p10 = scmp.lt.s32.totalorder %s2724_s24, %s3484_s0 }
  0x2b   : > { %p2510_p2 = pnand %p2509_p7, %p2508_p5  ;;  %p2514_p12 = scmp.lt.s32.totalorder %s2512_s12, %s2507_s30 }
  0x2d   : > { %p2511_p9 = pneg %p2510_p2  ;;  %p2515_p13 = por %p2514_p12, %p2513_p10 }
  0x2f   : > { %p2516_p0 = pnand %p2515_p13, %p2511_p9 }
  0x31   : > { %2519 = shalt.err (!%p2516_p0)
}
  0x32   : > { %s2520_s11 = scalar_lea.vmem %s2730_s26, 256  ;;  %s2608_s20 = smov [#allocation2]  }
  0x33   : > { %p2521_p1 = scmp.ne.s32.totalorder %s2730_s26, %s2520_s11  ;;  %s2525_s25 = sshll.u32 %s2608_s20, 4  ;;  %s2526_s25 = int_to_ptr.vmem [resolvable:$false] %s2525_s25 }
  0x34   : > { %s2527_s7 = scalar_lea.vmem %s2526_s25, 512  ;;  %p2528_p2 = scmp.lt.s32.totalorder %s2730_s26, %s2526_s25 }
  0x35   : > { %p2523_p6 = pnand %p2521_p1, %p2509_p7  ;;  %p2529_p3 = scmp.lt.s32.totalorder %s2527_s7, %s2520_s11 }
  0x37   : > { %p2524_p5 = pneg %p2523_p6  ;;  %p2530_p4 = por %p2529_p3, %p2528_p2 }
  0x39   : > { %p2531_p8 = pnand %p2530_p4, %p2524_p5 }
  0x3b   : > { %2534 = shalt.err (!%p2531_p8)
}
  0x3c   : > { %2429 = dma.hbm_to_vmem [thread:$0]  (!%p2726_p11), %s2724_s24, 256, %s2730_s26, %s2732_s29, %s2606_s5, %s2606_s5, %s2607_s6  }
  0x3d   : > { %p3522_p1 = scmp.ne.s32.totalorder %s3517_s23, 0 }
  0x3f   : > { %196 = sbr.rel (%p3522_p1) target bundleno = 530 (0x212), region = 36 }
  0x44   : > { %s2759_s30 = sand.u32 1, %s2595_s16   ;;  %p3523_p4 = scmp.ne.s32.totalorder %s3515_s21, 0 }
  0x45   : > { %s1766_s8 = sshll.u32 %s2759_s30, 4  ;;  %s199_s12 = scalar_lea.sflag [#allocation3], %s2759_s30 }
  0x46   : > { %s2765_s28 = scalar_lea.vmem [#allocation2], %s1766_s8 }
  0x47   : > { %2578 = dma.done.wait (%p3523_p4), %s199_s12, 256  }
  0x48   : > { %2580 = vsyncadd (%p3523_p4), %s199_s12, 4294967040  ;;  %p3524_p6 = scmp.eq.s32.totalorder %s2658_s19, 0 }
  0x4a   : > { %2582 = dma.done.wait (%p3524_p6), [#allocation6], 2048   ;;  %p3525_p8 = pmov %p3524_p6 }
  0x4b   : > { %v250_v0 = vld [vmem:[#allocation5 + $0x78] sm:$0xff]  ;;  %v249_v1 = vld [vmem:[#allocation5 + $0x70] sm:$0xff]  ;;  %v248_v2 = vld [vmem:[#allocation5 + $0x68] sm:$0xff]  ;;  %s1777_s24 = sshll.u32 %s2658_s19, 8  ;;  %s230_s26 = scalar_lea.vmem [#allocation7], %s1766_s8 }
  0x4c   : > { %2584 = vsyncadd (%p3525_p8), [#allocation6], 4294965248  ;;  %v2775_v3 = vand.u32 4294901760, %v250_v0  ;;  %v2777_v4 = vand.u32 4294901760, %v249_v1  ;;  %v2779_v5 = vand.u32 4294901760, %v248_v2  ;;  %v247_v6 = vld [vmem:[#allocation5 + $0x60] sm:$0xff]  ;;  %s3439_s11 = scalar_lea.hbm %s3488_s4, %s1777_s24 }
  0x4d   : > { %v246_v7 = vld [vmem:[#allocation5 + $0x58] sm:$0xff]  ;;  %v245_v8 = vld [vmem:[#allocation5 + $0x50] sm:$0xff]  ;;  %v2781_v9 = vand.u32 4294901760, %v247_v6  ;;  %v244_v12 = vld [vmem:[#allocation5 + $0x48] sm:$0xff]  ;;  %s1675_s29 = sshll.u32 %s230_s26, 4  ;;  %s1662_s19 = scalar_lea.sflag [#allocation4], %s2759_s30  ;;  %s3441_s29 = int_to_ptr.vmem [resolvable:$true] %s1675_s29 }
  0x4e   : > { %v2783_v10 = vand.u32 4294901760, %v246_v7  ;;  %v2785_v11 = vand.u32 4294901760, %v245_v8  ;;  %v243_v13 = vld [vmem:[#allocation5 + $0x40] sm:$0xff]  ;;  %1994 = vmatprep.subr.mxu0 %v2775_v3  ;;  %v2789_v14 = vsub.f32 %v250_v0, %v2775_v3  ;;  %v2792_v15 = vsub.f32 %v249_v1, %v2777_v4  ;;  %v242_v18 = vld [vmem:[#allocation5 + $0x38] sm:$0xff]  ;;  %v241_v25 = vld [vmem:[#allocation5 + $0x30] sm:$0xff]  ;;  %s2535_s20 = scalar_lea.vmem %s3441_s29, 256 }
  0x4f   : > { %v2794_v16 = vand.u32 4294901760, %v244_v12  ;;  %v2797_v17 = vsub.f32 %v248_v2, %v2779_v5  ;;  %1995 = vmatpush3.msra.mxu0 %v2775_v3  ;;  %v2801_v19 = vsub.f32 %v247_v6, %v2781_v9  ;;  %v2816_v24 = vand.u32 4294901760, %v243_v13  ;;  %v240_v35 = vld [vmem:[#allocation5 + $0x28] sm:$0xff]  ;;  %v239_v40 = vld [vmem:[#allocation5 + $0x20] sm:$0xff]  ;;  %v238_v48 = vld [vmem:[#allocation5 + $0x18] sm:$0xff]  ;;  %p2536_p3 = scmp.ne.s32.totalorder %s3441_s29, %s2535_s20  ;;  %p3554_p11 = scmp.ne.s32.totalorder %s3520_s10, 0 }
  0x50   : > { %v2804_v20 = vsub.f32 %v246_v7, %v2783_v10  ;;  %1996 = vmatprep.subr.mxu0 %v2777_v4  ;;  %v2808_v21 = vand.u32 4294901760, %v2789_v14  ;;  %v2811_v22 = vand.u32 4294901760, %v2792_v15  ;;  %v2822_v27 = vand.u32 4294901760, %v242_v18  ;;  %v2876_v49 = vld [vmem:[%s2765_s28] sm:$0xff]  ;;  %v2891_v54 = vld [vmem:[%s2765_s28 + $0x8] sm:$0xff]  ;;  %s2609_s25 = smov [#allocation7]  }
  0x51   : > { %v2814_v23 = vand.u32 4294901760, %v2797_v17  ;;  %1997 = vmatpush3.msra.mxu0 %v2777_v4  ;;  %v2820_v26 = vand.u32 4294901760, %v2801_v19  ;;  %v2828_v29 = vsub.f32 %v245_v8, %v2785_v11  ;;  %v2838_v33 = vsub.f32 %v244_v12, %v2794_v16  ;;  %3528 = vst [vmem:[#allocation13_spill] sm:$0xff] %v2876_v49  ;;  %3530 = vst [vmem:[#allocation15_spill] sm:$0xff] %v2891_v54  ;;  %v237_v59 = vld [vmem:[#allocation5 + $0x10] sm:$0xff]  ;;  %v236_v2 = vld [vmem:[#allocation5 + $0x8] sm:$0xff]  ;;  %p2537_p7 = pnand %p2536_p3, %p3554_p11 }
  0x52   : > { %v2825_v28 = vand.u32 4294901760, %v2804_v20  ;;  %1998 = vmatprep.subr.mxu0 %v2779_v5  ;;  %v356_v30 = vsub.f32 %v2789_v14, %v2808_v21  ;;  %v363_v31 = vsub.f32 %v2792_v15, %v2811_v22  ;;  %v2841_v34 = vand.u32 4294901760, %v241_v25  ;;  %s2539_s7 = sshll.u32 %s2609_s25, 4  ;;  %s2540_s7 = int_to_ptr.vmem [resolvable:$false] %s2539_s7 }
  0x53   : > { %v370_v32 = vsub.f32 %v2797_v17, %v2814_v23  ;;  %1999 = vmatpush3.msra.mxu0 %v2779_v5  ;;  %v377_v38 = vsub.f32 %v2801_v19, %v2820_v26  ;;  %v2851_v39 = vand.u32 4294901760, %v2828_v29  ;;  %v2857_v42 = vand.u32 4294901760, %v2838_v33  ;;  %p2538_p9 = pneg %p2537_p7  ;;  %s2541_s8 = scalar_lea.vmem %s2540_s7, 512 }
  0x54   : > { %2000 = vmatprep.subr.mxu0 %v2781_v9  ;;  %v2844_v36 = vand.u32 4294901760, %v356_v30  ;;  %v2846_v37 = vand.u32 4294901760, %v363_v31  ;;  %v384_v41 = vsub.f32 %v2804_v20, %v2825_v28  ;;  %v2860_v43 = vsub.f32 %v243_v13, %v2816_v24  ;;  %p2542_p10 = scmp.lt.s32.totalorder %s3441_s29, %s2540_s7  ;;  %p2543_p12 = scmp.lt.s32.totalorder %s2541_s8, %s2535_s20 }
  0x55   : > { %2001 = vmatpush3.msra.mxu0 %v2781_v9  ;;  %v2864_v44 = vand.u32 4294901760, %v370_v32  ;;  %v2866_v45 = vand.u32 4294901760, %v240_v35  ;;  %v2869_v46 = vsub.f32 %v242_v18, %v2822_v27  ;;  %v2873_v47 = vand.u32 4294901760, %v239_v40  ;;  %v235_v18 = vld [vmem:[#allocation5] sm:$0xff] }
  0x56   : > { %3526 = vst [vmem:[#allocation11_spill] sm:$0xff] %v2846_v37  ;;  %2002 = vmatprep.subr.mxu0 %v2783_v10  ;;  %2029 = vmatprep.subr.mxu1 %v2844_v36  ;;  %v2880_v50 = vand.u32 4294901760, %v377_v38  ;;  %v391_v51 = vsub.f32 %v2828_v29, %v2851_v39  ;;  %v2885_v52 = vand.u32 4294901760, %v2860_v43  ;;  %v2888_v53 = vsub.f32 %v241_v25, %v2841_v34  ;;  %p2544_p13 = por %p2543_p12, %p2542_p10 }
  0x57   : > { %3527 = vst [vmem:[#allocation12_spill] sm:$0xff] %v2864_v44  ;;  %2003 = vmatpush3.msra.mxu0 %v2783_v10  ;;  %2030 = vmatpush3.msra.mxu1 %v2844_v36  ;;  %v2895_v55 = vand.u32 4294901760, %v384_v41  ;;  %v398_v56 = vsub.f32 %v2838_v33, %v2857_v42  ;;  %v2901_v57 = vand.u32 4294901760, %v238_v48  ;;  %v2904_v58 = vand.u32 4294901760, %v2869_v46 }
  0x58   : > { %2004 = vmatprep.subr.mxu0 %v2785_v11  ;;  %2031 = vmatprep.subr.mxu1 %v2846_v37  ;;  %3529 = vst [vmem:[#allocation14_spill] sm:$0xff] %v2880_v50  ;;  %v2907_v60 = vsub.f32 %v240_v35, %v2866_v45  ;;  %v2910_v61 = vand.u32 4294901760, %v2876_v49  ;;  %v2915_v62 = vand.u32 4294901760, %v2891_v54  ;;  %v2919_v63 = vand.u32 4294901760, %v391_v51  ;;  %p2545_p0 = pnand %p2544_p13, %p2538_p9 }
  0x59   : > { %2005 = vmatpush3.msra.mxu0 %v2785_v11  ;;  %2032 = vmatpush3.msra.mxu1 %v2846_v37  ;;  %3531 = vst [vmem:[#allocation16_spill] sm:$0xff] %v2895_v55  ;;  %v405_v0 = vsub.f32 %v2860_v43, %v2885_v52  ;;  %v2924_v1 = vand.u32 4294901760, %v2888_v53  ;;  %v2927_v6 = vsub.f32 %v239_v40, %v2873_v47  ;;  %v2931_v7 = vand.u32 4294901760, %v398_v56 }
  0x5a   : > { %2006 = vmatprep.subr.mxu0 %v2794_v16  ;;  %2033 = vmatprep.subr.mxu1 %v2864_v44  ;;  %3532 = vst [vmem:[#allocation17_spill] sm:$0xff] %v2919_v63  ;;  %v2933_v8 = vand.u32 4294901760, %v237_v59  ;;  %v412_v12 = vsub.f32 %v2869_v46, %v2904_v58  ;;  %v2940_v13 = vand.u32 4294901760, %v2907_v60  ;;  %v2944_v25 = vsub.f32 %v2876_v49, %v2910_v61 }
  0x5b   : > { %2007 = vmatpush3.msra.mxu0 %v2794_v16  ;;  %2034 = vmatpush3.msra.mxu1 %v2864_v44  ;;  %3533 = vst [vmem:[#allocation18_spill] sm:$0xff] %v2931_v7  ;;  %v2947_v30 = vsub.f32 %v238_v48, %v2901_v57  ;;  %v2951_v31 = vand.u32 4294901760, %v236_v2  ;;  %v2955_v32 = vsub.f32 %v2891_v54, %v2915_v62  ;;  %v2959_v35 = vand.u32 4294901760, %v405_v0 }
  0x5c   : > { %2008 = vmatprep.subr.mxu0 %v2816_v24  ;;  %2035 = vmatprep.subr.mxu1 %v2880_v50  ;;  %v419_v38 = vsub.f32 %v2888_v53, %v2924_v1  ;;  %v2964_v40 = vand.u32 4294901760, %v2927_v6  ;;  %v2968_v41 = vand.u32 4294901760, %v235_v18  ;;  %v2971_v48 = vsub.f32 %v237_v59, %v2933_v8 }
  0x5d   : > { %2009 = vmatpush3.msra.mxu0 %v2816_v24  ;;  %2036 = vmatpush3.msra.mxu1 %v2880_v50  ;;  %3534 = vst [vmem:[#allocation19_spill] sm:$0xff] %v2959_v35  ;;  %v2975_v51 = vand.u32 4294901760, %v412_v12  ;;  %v426_v56 = vsub.f32 %v2907_v60, %v2940_v13 }
  0x5e   : > { %2010 = vmatprep.subr.mxu0 %v2822_v27  ;;  %2037 = vmatprep.subr.mxu1 %v2895_v55  ;;  %v2991_v12 = vand.u32 4294901760, %v419_v38  ;;  %v433_v0 = vsub.f32 %v2927_v6, %v2964_v40  ;;  %v3001_v59 = vsub.f32 %v235_v18, %v2968_v41  ;;  %v3537_v38 = vand.u32 4294901760, %v2944_v25 }
  0x5f   : > { %2011 = vmatpush3.msra.mxu0 %v2822_v27  ;;  %2038 = vmatpush3.msra.mxu1 %v2895_v55  ;;  %3535 = vst [vmem:[#allocation20_spill] sm:$0xff] %v2975_v51  ;;  %v2981_v55 = vand.u32 4294901760, %v2947_v30  ;;  %v3538_v18 = vand.u32 4294901760, %v2955_v32 }
  0x60   : > { %2012 = vmatprep.subr.mxu0 %v2841_v34  ;;  %2039 = vmatprep.subr.mxu1 %v2919_v63  ;;  %3536 = vst [vmem:[#allocation21_spill] sm:$0xff] %v2991_v12  ;;  %v335_v50 = vsub.f32 %v2944_v25, %v3537_v38 }
  0x61   : > { %2013 = vmatpush3.msra.mxu0 %v2841_v34  ;;  %2040 = vmatpush3.msra.mxu1 %v2919_v63  ;;  %v2987_v63 = vsub.f32 %v236_v2, %v2951_v31  ;;  %v3005_v2 = vand.u32 4294901760, %v426_v56  ;;  %v440_v44 = vsub.f32 %v2947_v30, %v2981_v55  ;;  %v3022_v56 = vand.u32 4294901760, %v433_v0 }
  0x62   : > { %2014 = vmatprep.subr.mxu0 %v2866_v45  ;;  %2041 = vmatprep.subr.mxu1 %v2931_v7 }
  0x63   : > { %2015 = vmatpush3.msra.mxu0 %v2866_v45  ;;  %2042 = vmatpush3.msra.mxu1 %v2931_v7  ;;  %v2998_v7 = vand.u32 4294901760, %v2971_v48  ;;  %v3018_v37 = vand.u32 4294901760, %v2987_v63  ;;  %v3033_v54 = vand.u32 4294901760, %v440_v44 }
  0x64   : > { %2016 = vmatprep.subr.mxu0 %v2873_v47  ;;  %2043 = vmatprep.subr.mxu1 %v2959_v35 }
  0x65   : > { %2017 = vmatpush3.msra.mxu0 %v2873_v47  ;;  %2044 = vmatpush3.msra.mxu1 %v2959_v35  ;;  %v345_v35 = vsub.f32 %v2955_v32, %v3538_v18  ;;  %v447_v38 = vsub.f32 %v2971_v48, %v2998_v7  ;;  %v336_v18 = vand.u32 4294901760, %v335_v50 }
  0x66   : > { %2018 = vmatprep.subr.mxu0 %v2901_v57  ;;  %2045 = vmatprep.subr.mxu1 %v2975_v51 }
  0x67   : > { %2019 = vmatpush3.msra.mxu0 %v2901_v57  ;;  %2046 = vmatpush3.msra.mxu1 %v2975_v51  ;;  %v3029_v51 = vand.u32 4294901760, %v3001_v59  ;;  %v346_v0 = vand.u32 4294901760, %v345_v35  ;;  %v3043_v49 = vand.u32 4294901760, %v447_v38  ;;  %v3541_v38 = vand.u32 4294901760, %v2955_v32 }
  0x68   : > { %2020 = vmatprep.subr.mxu0 %v2933_v8  ;;  %2047 = vmatprep.subr.mxu1 %v2991_v12 }
  0x69   : > { %2021 = vmatpush3.msra.mxu0 %v2933_v8  ;;  %2048 = vmatpush3.msra.mxu1 %v2991_v12  ;;  %3539 = vst [vmem:[#allocation22_spill] sm:$0xff] %v3029_v51  ;;  %v454_v12 = vsub.f32 %v2987_v63, %v3018_v37  ;;  %v461_v44 = vsub.f32 %v3001_v59, %v3029_v51 }
  0x6a   : > { %2022 = vmatprep.subr.mxu0 %v2951_v31  ;;  %2049 = vmatprep.subr.mxu1 %v3005_v2 }
  0x6b   : > { %2023 = vmatpush3.msra.mxu0 %v2951_v31  ;;  %2050 = vmatpush3.msra.mxu1 %v3005_v2  ;;  %v3049_v50 = vand.u32 4294901760, %v454_v12  ;;  %v3055_v35 = vand.u32 4294901760, %v461_v44  ;;  %v3540_v12 = vand.u32 4294901760, %v2944_v25 }
  0x6c   : > { %2024 = vmatprep.subr.mxu0 %v2968_v41  ;;  %2051 = vmatprep.subr.mxu1 %v3022_v56 }
  0x6d   : > { %2025 = vmatpush3.msra.mxu0 %v2968_v41  ;;  %2052 = vmatpush3.msra.mxu1 %v3022_v56 }
  0x6e   : > { %2026 = vmatprep.mubr.f32.mxu0 %v336_v18  ;;  %2053 = vmatprep.subr.mxu1 %v3033_v54  ;;  %v3543_v18 = vld [vmem:[#allocation15_spill] sm:$0xff] }
  0x6f   : > { %2064 = vmatprep.subr.mxu0 %v2789_v14  ;;  %2027 = vmatmul.mubr.f32.vlgmr.msra.gmra.mxu0 %v346_v0  ;;  %v936_v0 = vmul.f32 %v3543_v18, %v3543_v18 }
  0x70   : > { %2054 = vmatpush3.msra.mxu1 %v3033_v54  ;;  %2065 = vmatpush3.msra.mxu0 %v2789_v14 }
  0x71   : > { %2055 = vmatprep.subr.mxu1 %v3043_v49  ;;  %2066 = vmatprep.subr.mxu0 %v2792_v15 }
  0x72   : > { %2056 = vmatpush3.msra.mxu1 %v3043_v49  ;;  %2067 = vmatpush3.msra.mxu0 %v2792_v15 }
  0x73   : > { %2057 = vmatprep.subr.mxu1 %v3049_v50  ;;  %2068 = vmatprep.subr.mxu0 %v2797_v17 }
  0x74   : > { %2058 = vmatpush3.msra.mxu1 %v3049_v50  ;;  %2069 = vmatpush3.msra.mxu0 %v2797_v17 }
  0x75   : > { %2059 = vmatprep.subr.mxu1 %v3055_v35  ;;  %2070 = vmatprep.subr.mxu0 %v2801_v19 }
  0x76   : > { %2060 = vmatpush3.msra.mxu1 %v3055_v35  ;;  %2061 = vmatprep.mubr.f32.mxu1 %v2910_v61 }
  0x77   : > { %2071 = vmatpush3.msra.mxu0 %v2801_v19  ;;  %2062 = vmatmul.mubr.f32.vlgmr.msra.gmra.mxu1 %v2915_v62 }
  0x78   : > { %2072 = vmatprep.subr.mxu0 %v2804_v20  ;;  %2099 = vmatprep.subr.mxu1 %v2775_v3 }
  0x79   : > { %2073 = vmatpush3.msra.mxu0 %v2804_v20  ;;  %2100 = vmatpush3.msra.mxu1 %v2775_v3 }
  0x7a   : > { %2074 = vmatprep.subr.mxu0 %v2828_v29  ;;  %2101 = vmatprep.subr.mxu1 %v2777_v4 }
  0x7b   : > { %2075 = vmatpush3.msra.mxu0 %v2828_v29  ;;  %2102 = vmatpush3.msra.mxu1 %v2777_v4 }
  0x7c   : > { %2076 = vmatprep.subr.mxu0 %v2838_v33  ;;  %2103 = vmatprep.subr.mxu1 %v2779_v5 }
  0x7d   : > { %2077 = vmatpush3.msra.mxu0 %v2838_v33  ;;  %2104 = vmatpush3.msra.mxu1 %v2779_v5 }
  0x7e   : > { %2078 = vmatprep.subr.mxu0 %v2860_v43  ;;  %2105 = vmatprep.subr.mxu1 %v2781_v9 }
  0x7f   : > { %2079 = vmatpush3.msra.mxu0 %v2860_v43  ;;  %2106 = vmatpush3.msra.mxu1 %v2781_v9 }
  0x80   : > { %2080 = vmatprep.subr.mxu0 %v2869_v46  ;;  %2107 = vmatprep.subr.mxu1 %v2783_v10 }
  0x81   : > { %2081 = vmatpush3.msra.mxu0 %v2869_v46  ;;  %2108 = vmatpush3.msra.mxu1 %v2783_v10 }
  0x82   : > { %2082 = vmatprep.subr.mxu0 %v2888_v53  ;;  %2109 = vmatprep.subr.mxu1 %v2785_v11 }
  0x83   : > { %2083 = vmatpush3.msra.mxu0 %v2888_v53  ;;  %2110 = vmatpush3.msra.mxu1 %v2785_v11 }
  0x84   : > { %2084 = vmatprep.subr.mxu0 %v2907_v60  ;;  %2111 = vmatprep.subr.mxu1 %v2794_v16 }
  0x85   : > { %2085 = vmatpush3.msra.mxu0 %v2907_v60  ;;  %2112 = vmatpush3.msra.mxu1 %v2794_v16 }
  0x86   : > { %2086 = vmatprep.subr.mxu0 %v2927_v6  ;;  %2113 = vmatprep.subr.mxu1 %v2816_v24 }
  0x87   : > { %2087 = vmatpush3.msra.mxu0 %v2927_v6  ;;  %2114 = vmatpush3.msra.mxu1 %v2816_v24 }
  0x88   : > { %2088 = vmatprep.subr.mxu0 %v2947_v30  ;;  %2115 = vmatprep.subr.mxu1 %v2822_v27 }
  0x89   : > { %2089 = vmatpush3.msra.mxu0 %v2947_v30  ;;  %2116 = vmatpush3.msra.mxu1 %v2822_v27 }
  0x8a   : > { %2090 = vmatprep.subr.mxu0 %v2971_v48  ;;  %2117 = vmatprep.subr.mxu1 %v2841_v34 }
  0x8b   : > { %2091 = vmatpush3.msra.mxu0 %v2971_v48  ;;  %2118 = vmatpush3.msra.mxu1 %v2841_v34 }
  0x8c   : > { %2092 = vmatprep.subr.mxu0 %v2987_v63  ;;  %2119 = vmatprep.subr.mxu1 %v2866_v45 }
  0x8d   : > { %2093 = vmatpush3.msra.mxu0 %v2987_v63  ;;  %2120 = vmatpush3.msra.mxu1 %v2866_v45 }
  0x8e   : > { %2094 = vmatprep.subr.mxu0 %v3001_v59  ;;  %2121 = vmatprep.subr.mxu1 %v2873_v47 }
  0x8f   : > { %2095 = vmatpush3.msra.mxu0 %v3001_v59  ;;  %2096 = vmatprep.mubr.f32.mxu0 %v2944_v25  ;;  %v3542_v25 = vld [vmem:[#allocation13_spill] sm:$0xff] }
  0x90   : > { %2122 = vmatpush3.msra.mxu1 %v2873_v47  ;;  %2097 = vmatmul.mubr.f32.vlgmr.msra.gmra.mxu0 %v2955_v32  ;;  %v935_v32 = vmul.f32 %v3542_v25, %v3542_v25 }
  0x91   : > { %2123 = vmatprep.subr.mxu1 %v2901_v57  ;;  %2134 = vmatprep.subr.mxu0 %v2808_v21 }
  0x92   : > { %2124 = vmatpush3.msra.mxu1 %v2901_v57  ;;  %2135 = vmatpush3.msra.mxu0 %v2808_v21  ;;  %v3221_v44 = vand.u32 4294901760, %v935_v32 }
  0x93   : > { %2125 = vmatprep.subr.mxu1 %v2933_v8  ;;  %2136 = vmatprep.subr.mxu0 %v2811_v22 }
  0x94   : > { %2126 = vmatpush3.msra.mxu1 %v2933_v8  ;;  %2137 = vmatpush3.msra.mxu0 %v2811_v22  ;;  %v3234_v25 = vsub.f32 %v935_v32, %v3221_v44 }
  0x95   : > { %2127 = vmatprep.subr.mxu1 %v2951_v31  ;;  %2138 = vmatprep.subr.mxu0 %v2814_v23 }
  0x96   : > { %2128 = vmatpush3.msra.mxu1 %v2951_v31  ;;  %2139 = vmatpush3.msra.mxu0 %v2814_v23  ;;  %v1020_v32 = vand.u32 4294901760, %v3234_v25 }
  0x97   : > { %2129 = vmatprep.subr.mxu1 %v2968_v41  ;;  %2140 = vmatprep.subr.mxu0 %v2820_v26 }
  0x98   : > { %2130 = vmatpush3.msra.mxu1 %v2968_v41  ;;  %2131 = vmatprep.mubr.f32.mxu1 %v3540_v12  ;;  %v3546_v12 = vld [vmem:[#allocation14_spill] sm:$0xff] }
  0x99   : > { %2141 = vmatpush3.msra.mxu0 %v2820_v26  ;;  %2132 = vmatmul.mubr.f32.vlgmr.msra.gmra.mxu1 %v3541_v38  ;;  %v3547_v38 = vld [vmem:[#allocation16_spill] sm:$0xff] }
  0x9a   : > { %2142 = vmatprep.subr.mxu0 %v2825_v28  ;;  %2169 = vmatprep.subr.mxu1 %v2775_v3 }
  0x9b   : > { %2143 = vmatpush3.msra.mxu0 %v2825_v28  ;;  %2170 = vmatpush3.msra.mxu1 %v2775_v3 }
  0x9c   : > { %2144 = vmatprep.subr.mxu0 %v2851_v39  ;;  %2171 = vmatprep.subr.mxu1 %v2777_v4 }
  0x9d   : > { %2145 = vmatpush3.msra.mxu0 %v2851_v39  ;;  %2172 = vmatpush3.msra.mxu1 %v2777_v4 }
  0x9e   : > { %2146 = vmatprep.subr.mxu0 %v2857_v42  ;;  %2173 = vmatprep.subr.mxu1 %v2779_v5 }
  0x9f   : > { %2147 = vmatpush3.msra.mxu0 %v2857_v42  ;;  %2174 = vmatpush3.msra.mxu1 %v2779_v5 }
  0xa0   : > { %2148 = vmatprep.subr.mxu0 %v2885_v52  ;;  %2175 = vmatprep.subr.mxu1 %v2781_v9 }
  0xa1   : > { %2149 = vmatpush3.msra.mxu0 %v2885_v52  ;;  %2176 = vmatpush3.msra.mxu1 %v2781_v9 }
  0xa2   : > { %2150 = vmatprep.subr.mxu0 %v2904_v58  ;;  %2177 = vmatprep.subr.mxu1 %v2783_v10 }
  0xa3   : > { %2151 = vmatpush3.msra.mxu0 %v2904_v58  ;;  %2178 = vmatpush3.msra.mxu1 %v2783_v10 }
  0xa4   : > { %2152 = vmatprep.subr.mxu0 %v2924_v1  ;;  %2179 = vmatprep.subr.mxu1 %v2785_v11 }
  0xa5   : > { %2153 = vmatpush3.msra.mxu0 %v2924_v1  ;;  %2180 = vmatpush3.msra.mxu1 %v2785_v11 }
  0xa6   : > { %2154 = vmatprep.subr.mxu0 %v2940_v13  ;;  %2181 = vmatprep.subr.mxu1 %v2794_v16 }
  0xa7   : > { %2155 = vmatpush3.msra.mxu0 %v2940_v13  ;;  %2182 = vmatpush3.msra.mxu1 %v2794_v16 }
  0xa8   : > { %2156 = vmatprep.subr.mxu0 %v2964_v40  ;;  %2183 = vmatprep.subr.mxu1 %v2816_v24 }
  0xa9   : > { %2157 = vmatpush3.msra.mxu0 %v2964_v40  ;;  %2184 = vmatpush3.msra.mxu1 %v2816_v24 }
  0xaa   : > { %2158 = vmatprep.subr.mxu0 %v2981_v55  ;;  %2185 = vmatprep.subr.mxu1 %v2822_v27 }
  0xab   : > { %2159 = vmatpush3.msra.mxu0 %v2981_v55  ;;  %2186 = vmatpush3.msra.mxu1 %v2822_v27 }
  0xac   : > { %2160 = vmatprep.subr.mxu0 %v2998_v7  ;;  %2187 = vmatprep.subr.mxu1 %v2841_v34 }
  0xad   : > { %2161 = vmatpush3.msra.mxu0 %v2998_v7  ;;  %2188 = vmatpush3.msra.mxu1 %v2841_v34 }
  0xae   : > { %2162 = vmatprep.subr.mxu0 %v3018_v37  ;;  %2189 = vmatprep.subr.mxu1 %v2866_v45 }
  0xaf   : > { %2163 = vmatpush3.msra.mxu0 %v3018_v37  ;;  %2190 = vmatpush3.msra.mxu1 %v2866_v45 }
  0xb0   : > { %2164 = vmatprep.subr.mxu0 %v3029_v51  ;;  %2191 = vmatprep.subr.mxu1 %v2873_v47 }
  0xb1   : > { %2165 = vmatpush3.msra.mxu0 %v3029_v51  ;;  %2166 = vmatprep.mubr.f32.mxu0 %v2910_v61  ;;  %v3552_v51 = vld [vmem:[#allocation21_spill] sm:$0xff] }
  0xb2   : > { %2192 = vmatpush3.msra.mxu1 %v2873_v47  ;;  %2167 = vmatmul.mubr.f32.vlgmr.msra.gmra.mxu0 %v2915_v62 }
  0xb3   : > { %2193 = vmatprep.subr.mxu1 %v2901_v57  ;;  %2204 = vmatprep.subr.mxu0 %v2775_v3 }
  0xb4   : > { %2194 = vmatpush3.msra.mxu1 %v2901_v57  ;;  %2205 = vmatpush3.msra.mxu0 %v2775_v3 }
  0xb5   : > { %2195 = vmatprep.subr.mxu1 %v2933_v8  ;;  %2206 = vmatprep.subr.mxu0 %v2777_v4 }
  0xb6   : > { %2196 = vmatpush3.msra.mxu1 %v2933_v8  ;;  %2207 = vmatpush3.msra.mxu0 %v2777_v4 }
  0xb7   : > { %2197 = vmatprep.subr.mxu1 %v2951_v31  ;;  %2208 = vmatprep.subr.mxu0 %v2779_v5 }
  0xb8   : > { %2198 = vmatpush3.msra.mxu1 %v2951_v31  ;;  %2209 = vmatpush3.msra.mxu0 %v2779_v5 }
  0xb9   : > { %2199 = vmatprep.subr.mxu1 %v2968_v41  ;;  %2210 = vmatprep.subr.mxu0 %v2781_v9 }
  0xba   : > { %2200 = vmatpush3.msra.mxu1 %v2968_v41  ;;  %2201 = vmatprep.mubr.f32.mxu1 %v2910_v61  ;;  %v3544_v61 = vld [vmem:[#allocation11_spill] sm:$0xff] }
  0xbb   : > { %2211 = vmatpush3.msra.mxu0 %v2781_v9  ;;  %2202 = vmatmul.mubr.f32.vlgmr.msra.gmra.mxu1 %v2915_v62  ;;  %v3545_v62 = vld [vmem:[#allocation12_spill] sm:$0xff] }
  0xbc   : > { %2212 = vmatprep.subr.mxu0 %v2783_v10  ;;  %2239 = vmatprep.subr.mxu1 %v2844_v36 }
  0xbd   : > { %2213 = vmatpush3.msra.mxu0 %v2783_v10  ;;  %2240 = vmatpush3.msra.mxu1 %v2844_v36  ;;  %v3225_v36 = vand.u32 4294901760, %v936_v0 }
  0xbe   : > { %2214 = vmatprep.subr.mxu0 %v2785_v11  ;;  %2241 = vmatprep.subr.mxu1 %v3544_v61 }
  0xbf   : > { %2215 = vmatpush3.msra.mxu0 %v2785_v11  ;;  %2242 = vmatpush3.msra.mxu1 %v3544_v61  ;;  %v3239_v18 = vsub.f32 %v936_v0, %v3225_v36  ;;  %v3548_v61 = vld [vmem:[#allocation17_spill] sm:$0xff] }
  0xc0   : > { %2216 = vmatprep.subr.mxu0 %v2794_v16  ;;  %2243 = vmatprep.subr.mxu1 %v3545_v62 }
  0xc1   : > { %2217 = vmatpush3.msra.mxu0 %v2794_v16  ;;  %2244 = vmatpush3.msra.mxu1 %v3545_v62  ;;  %v3549_v62 = vld [vmem:[#allocation18_spill] sm:$0xff]  ;;  %v1030_v0 = vand.u32 4294901760, %v3239_v18 }
  0xc2   : > { %2218 = vmatprep.subr.mxu0 %v2816_v24  ;;  %2245 = vmatprep.subr.mxu1 %v3546_v12 }
  0xc3   : > { %2219 = vmatpush3.msra.mxu0 %v2816_v24  ;;  %2246 = vmatpush3.msra.mxu1 %v3546_v12  ;;  %v3550_v12 = vld [vmem:[#allocation19_spill] sm:$0xff] }
  0xc4   : > { %2220 = vmatprep.subr.mxu0 %v2822_v27  ;;  %2247 = vmatprep.subr.mxu1 %v3547_v38 }
  0xc5   : > { %2221 = vmatpush3.msra.mxu0 %v2822_v27  ;;  %2248 = vmatpush3.msra.mxu1 %v3547_v38  ;;  %v3551_v38 = vld [vmem:[#allocation20_spill] sm:$0xff] }
  0xc6   : > { %2222 = vmatprep.subr.mxu0 %v2841_v34  ;;  %2249 = vmatprep.subr.mxu1 %v3548_v61 }
  0xc7   : > { %2223 = vmatpush3.msra.mxu0 %v2841_v34  ;;  %2250 = vmatpush3.msra.mxu1 %v3548_v61  ;;  %v1021_v61 = vsub.f32 %v3234_v25, %v1020_v32 }
  0xc8   : > { %2224 = vmatprep.subr.mxu0 %v2866_v45  ;;  %2251 = vmatprep.subr.mxu1 %v3549_v62 }
  0xc9   : > { %2225 = vmatpush3.msra.mxu0 %v2866_v45  ;;  %2252 = vmatpush3.msra.mxu1 %v3549_v62  ;;  %v1031_v62 = vsub.f32 %v3239_v18, %v1030_v0 }
  0xca   : > { %2226 = vmatprep.subr.mxu0 %v2873_v47  ;;  %2253 = vmatprep.subr.mxu1 %v3550_v12 }
  0xcb   : > { %2227 = vmatpush3.msra.mxu0 %v2873_v47  ;;  %2254 = vmatpush3.msra.mxu1 %v3550_v12  ;;  %v1022_v12 = vand.u32 4294901760, %v1021_v61 }
  0xcc   : > { %2228 = vmatprep.subr.mxu0 %v2901_v57  ;;  %2255 = vmatprep.subr.mxu1 %v3551_v38 }
  0xcd   : > { %2229 = vmatpush3.msra.mxu0 %v2901_v57  ;;  %2256 = vmatpush3.msra.mxu1 %v3551_v38  ;;  %v1032_v38 = vand.u32 4294901760, %v1031_v62  ;;  %v1770_v62 = vld [vmem:[%s3486_s2] ss:$0 sm:$0xff] }
  0xce   : > { %2230 = vmatprep.subr.mxu0 %v2933_v8  ;;  %2257 = vmatprep.subr.mxu1 %v3552_v51 }
  0xcf   : > { %2231 = vmatpush3.msra.mxu0 %v2933_v8  ;;  %2258 = vmatpush3.msra.mxu1 %v3552_v51 }
  0xd0   : > { %2232 = vmatprep.subr.mxu0 %v2951_v31  ;;  %2259 = vmatprep.subr.mxu1 %v3005_v2 }
  0xd1   : > { %2233 = vmatpush3.msra.mxu0 %v2951_v31  ;;  %2260 = vmatpush3.msra.mxu1 %v3005_v2 }
  0xd2   : > { %2234 = vmatprep.subr.mxu0 %v2968_v41  ;;  %2261 = vmatprep.subr.mxu1 %v3022_v56 }
  0xd3   : > { %2235 = vmatpush3.msra.mxu0 %v2968_v41  ;;  %2262 = vmatpush3.msra.mxu1 %v3022_v56 }
  0xd4   : > { %2236 = vmatprep.mubr.f32.mxu0 %v1022_v12  ;;  %2263 = vmatprep.subr.mxu1 %v3033_v54 }
  0xd5   : > { %2274 = vmatprep.subr.mxu0 %v2789_v14  ;;  %2237 = vmatmul.mubr.f32.vlgmr.msra.gmra.mxu0 %v1032_v38 }
  0xd6   : > { %2264 = vmatpush3.msra.mxu1 %v3033_v54  ;;  %2275 = vmatpush3.msra.mxu0 %v2789_v14 }
  0xd7   : > { %2265 = vmatprep.subr.mxu1 %v3043_v49  ;;  %2276 = vmatprep.subr.mxu0 %v2792_v15 }
  0xd8   : > { %2266 = vmatpush3.msra.mxu1 %v3043_v49  ;;  %2277 = vmatpush3.msra.mxu0 %v2792_v15 }
  0xd9   : > { %2267 = vmatprep.subr.mxu1 %v3049_v50  ;;  %2278 = vmatprep.subr.mxu0 %v2797_v17 }
  0xda   : > { %2268 = vmatpush3.msra.mxu1 %v3049_v50  ;;  %2279 = vmatpush3.msra.mxu0 %v2797_v17 }
  0xdb   : > { %2269 = vmatprep.subr.mxu1 %v3055_v35  ;;  %2280 = vmatprep.subr.mxu0 %v2801_v19 }
  0xdc   : > { %2270 = vmatpush3.msra.mxu1 %v3055_v35  ;;  %2271 = vmatprep.mubr.f32.mxu1 %v3221_v44 }
  0xdd   : > { %2281 = vmatpush3.msra.mxu0 %v2801_v19  ;;  %2272 = vmatmul.mubr.f32.vlgmr.msra.gmra.mxu1 %v3225_v36 }
  0xde   : > { %2282 = vmatprep.subr.mxu0 %v2804_v20  ;;  %2309 = vmatprep.subr.mxu1 %v2775_v3 }
  0xdf   : > { %2283 = vmatpush3.msra.mxu0 %v2804_v20  ;;  %2310 = vmatpush3.msra.mxu1 %v2775_v3 }
  0xe0   : > { %2284 = vmatprep.subr.mxu0 %v2828_v29  ;;  %2311 = vmatprep.subr.mxu1 %v2777_v4 }
  0xe1   : > { %2285 = vmatpush3.msra.mxu0 %v2828_v29  ;;  %2312 = vmatpush3.msra.mxu1 %v2777_v4 }
  0xe2   : > { %2286 = vmatprep.subr.mxu0 %v2838_v33  ;;  %2313 = vmatprep.subr.mxu1 %v2779_v5 }
  0xe3   : > { %2287 = vmatpush3.msra.mxu0 %v2838_v33  ;;  %2314 = vmatpush3.msra.mxu1 %v2779_v5 }
  0xe4   : > { %2288 = vmatprep.subr.mxu0 %v2860_v43  ;;  %2315 = vmatprep.subr.mxu1 %v2781_v9 }
  0xe5   : > { %2289 = vmatpush3.msra.mxu0 %v2860_v43  ;;  %2316 = vmatpush3.msra.mxu1 %v2781_v9 }
  0xe6   : > { %2290 = vmatprep.subr.mxu0 %v2869_v46  ;;  %2317 = vmatprep.subr.mxu1 %v2783_v10 }
  0xe7   : > { %2291 = vmatpush3.msra.mxu0 %v2869_v46  ;;  %2318 = vmatpush3.msra.mxu1 %v2783_v10 }
  0xe8   : > { %2292 = vmatprep.subr.mxu0 %v2888_v53  ;;  %2319 = vmatprep.subr.mxu1 %v2785_v11 }
  0xe9   : > { %2293 = vmatpush3.msra.mxu0 %v2888_v53  ;;  %2320 = vmatpush3.msra.mxu1 %v2785_v11 }
  0xea   : > { %2294 = vmatprep.subr.mxu0 %v2907_v60  ;;  %2321 = vmatprep.subr.mxu1 %v2794_v16 }
  0xeb   : > { %2295 = vmatpush3.msra.mxu0 %v2907_v60  ;;  %2322 = vmatpush3.msra.mxu1 %v2794_v16 }
  0xec   : > { %2296 = vmatprep.subr.mxu0 %v2927_v6  ;;  %2323 = vmatprep.subr.mxu1 %v2816_v24 }
  0xed   : > { %2297 = vmatpush3.msra.mxu0 %v2927_v6  ;;  %2324 = vmatpush3.msra.mxu1 %v2816_v24 }
  0xee   : > { %2298 = vmatprep.subr.mxu0 %v2947_v30  ;;  %2325 = vmatprep.subr.mxu1 %v2822_v27 }
  0xef   : > { %2299 = vmatpush3.msra.mxu0 %v2947_v30  ;;  %2326 = vmatpush3.msra.mxu1 %v2822_v27 }
  0xf0   : > { %2300 = vmatprep.subr.mxu0 %v2971_v48  ;;  %2327 = vmatprep.subr.mxu1 %v2841_v34 }
  0xf1   : > { %2301 = vmatpush3.msra.mxu0 %v2971_v48  ;;  %2328 = vmatpush3.msra.mxu1 %v2841_v34 }
  0xf2   : > { %2302 = vmatprep.subr.mxu0 %v2987_v63  ;;  %2329 = vmatprep.subr.mxu1 %v2866_v45 }
  0xf3   : > { %2303 = vmatpush3.msra.mxu0 %v2987_v63  ;;  %2330 = vmatpush3.msra.mxu1 %v2866_v45 }
  0xf4   : > { %2304 = vmatprep.subr.mxu0 %v3001_v59  ;;  %2331 = vmatprep.subr.mxu1 %v2873_v47 }
  0xf5   : > { %2305 = vmatpush3.msra.mxu0 %v3001_v59  ;;  %2306 = vmatprep.mubr.f32.mxu0 %v3234_v25 }
  0xf6   : > { %2332 = vmatpush3.msra.mxu1 %v2873_v47  ;;  %2307 = vmatmul.mubr.f32.vlgmr.msra.gmra.mxu0 %v3239_v18  ;;  %v1769_v18 = vld [vmem:[%s3485_s1] ss:$0 sm:$0xff] }
  0xf7   : > { %2333 = vmatprep.subr.mxu1 %v2901_v57  ;;  %2344 = vmatprep.subr.mxu0 %v2808_v21 }
  0xf8   : > { %2334 = vmatpush3.msra.mxu1 %v2901_v57  ;;  %2345 = vmatpush3.msra.mxu0 %v2808_v21 }
  0xf9   : > { %2335 = vmatprep.subr.mxu1 %v2933_v8  ;;  %2346 = vmatprep.subr.mxu0 %v2811_v22 }
  0xfa   : > { %2336 = vmatpush3.msra.mxu1 %v2933_v8  ;;  %2347 = vmatpush3.msra.mxu0 %v2811_v22 }
  0xfb   : > { %2337 = vmatprep.subr.mxu1 %v2951_v31  ;;  %2348 = vmatprep.subr.mxu0 %v2814_v23 }
  0xfc   : > { %2338 = vmatpush3.msra.mxu1 %v2951_v31  ;;  %2349 = vmatpush3.msra.mxu0 %v2814_v23 }
  0xfd   : > { %2339 = vmatprep.subr.mxu1 %v2968_v41  ;;  %2350 = vmatprep.subr.mxu0 %v2820_v26 }
  0xfe   : > { %2340 = vmatpush3.msra.mxu1 %v2968_v41  ;;  %2341 = vmatprep.mubr.f32.mxu1 %v1020_v32 }
  0xff   : > { %2351 = vmatpush3.msra.mxu0 %v2820_v26  ;;  %2342 = vmatmul.mubr.f32.vlgmr.msra.gmra.mxu1 %v1030_v0 }
 0x100   : > { %2352 = vmatprep.subr.mxu0 %v2825_v28  ;;  %2379 = vmatprep.subr.mxu1 %v2775_v3 }
 0x101   : > { %2353 = vmatpush3.msra.mxu0 %v2825_v28  ;;  %2380 = vmatpush3.msra.mxu1 %v2775_v3  ;;  %v3553_v3 = vld [vmem:[#allocation22_spill] sm:$0xff] }
 0x102   : > { %2354 = vmatprep.subr.mxu0 %v2851_v39  ;;  %2381 = vmatprep.subr.mxu1 %v2777_v4 }
 0x103   : > { %2355 = vmatpush3.msra.mxu0 %v2851_v39  ;;  %2382 = vmatpush3.msra.mxu1 %v2777_v4 }
 0x104   : > { %2356 = vmatprep.subr.mxu0 %v2857_v42  ;;  %2383 = vmatprep.subr.mxu1 %v2779_v5 }
 0x105   : > { %2357 = vmatpush3.msra.mxu0 %v2857_v42  ;;  %2384 = vmatpush3.msra.mxu1 %v2779_v5 }
 0x106   : > { %2358 = vmatprep.subr.mxu0 %v2885_v52  ;;  %2385 = vmatprep.subr.mxu1 %v2781_v9 }
 0x107   : > { %2359 = vmatpush3.msra.mxu0 %v2885_v52  ;;  %2386 = vmatpush3.msra.mxu1 %v2781_v9 }
 0x108   : > { %2360 = vmatprep.subr.mxu0 %v2904_v58  ;;  %2387 = vmatprep.subr.mxu1 %v2783_v10 }
 0x109   : > { %2361 = vmatpush3.msra.mxu0 %v2904_v58  ;;  %2388 = vmatpush3.msra.mxu1 %v2783_v10 }
 0x10a   : > { %2362 = vmatprep.subr.mxu0 %v2924_v1  ;;  %2389 = vmatprep.subr.mxu1 %v2785_v11 }
 0x10b   : > { %2363 = vmatpush3.msra.mxu0 %v2924_v1  ;;  %2390 = vmatpush3.msra.mxu1 %v2785_v11 }
 0x10c   : > { %2364 = vmatprep.subr.mxu0 %v2940_v13  ;;  %2391 = vmatprep.subr.mxu1 %v2794_v16 }
 0x10d   : > { %2365 = vmatpush3.msra.mxu0 %v2940_v13  ;;  %2392 = vmatpush3.msra.mxu1 %v2794_v16 }
 0x10e   : > { %2366 = vmatprep.subr.mxu0 %v2964_v40  ;;  %2393 = vmatprep.subr.mxu1 %v2816_v24 }
 0x10f   : > { %2367 = vmatpush3.msra.mxu0 %v2964_v40  ;;  %2394 = vmatpush3.msra.mxu1 %v2816_v24 }
 0x110   : > { %2368 = vmatprep.subr.mxu0 %v2981_v55  ;;  %2395 = vmatprep.subr.mxu1 %v2822_v27 }
 0x111   : > { %2369 = vmatpush3.msra.mxu0 %v2981_v55  ;;  %2396 = vmatpush3.msra.mxu1 %v2822_v27 }
 0x112   : > { %2370 = vmatprep.subr.mxu0 %v2998_v7  ;;  %2397 = vmatprep.subr.mxu1 %v2841_v34 }
 0x113   : > { %2371 = vmatpush3.msra.mxu0 %v2998_v7  ;;  %2398 = vmatpush3.msra.mxu1 %v2841_v34 }
 0x114   : > { %2372 = vmatprep.subr.mxu0 %v3018_v37  ;;  %2399 = vmatprep.subr.mxu1 %v2866_v45 }
 0x115   : > { %2373 = vmatpush3.msra.mxu0 %v3018_v37  ;;  %2400 = vmatpush3.msra.mxu1 %v2866_v45 }
 0x116   : > { %2374 = vmatprep.subr.mxu0 %v3553_v3  ;;  %2401 = vmatprep.subr.mxu1 %v2873_v47 }
 0x117   : > { %2375 = vmatpush3.msra.mxu0 %v3553_v3  ;;  %2376 = vmatprep.mubr.f32.mxu0 %v3221_v44  ;;  %v2479_v3 = vld [vmem:[%s2765_s28 + $0x8] sm:$0xff] }
 0x118   : > { %2402 = vmatpush3.msra.mxu1 %v2873_v47  ;;  %2377 = vmatmul.mubr.f32.vlgmr.msra.gmra.mxu0 %v3225_v36 }
 0x119   : > { %2403 = vmatprep.subr.mxu1 %v2901_v57  ;;  %2411 = vmatprep.mubr.f32.mxu1 %v3221_v44 }
 0x11a   : > { %2404 = vmatpush3.msra.mxu1 %v2901_v57 }
 0x11b   : > { %2405 = vmatprep.subr.mxu1 %v2933_v8 }
 0x11c   : > { %2406 = vmatpush3.msra.mxu1 %v2933_v8 }
 0x11d   : > { %2407 = vmatprep.subr.mxu1 %v2951_v31 }
 0x11e   : > { %2408 = vmatpush3.msra.mxu1 %v2951_v31 }
 0x11f   : > { %2409 = vmatprep.subr.mxu1 %v2968_v41 }
 0x120   : > { %2410 = vmatpush3.msra.mxu1 %v2968_v41 }
 0x121   : > { %2412 = vmatmul.mubr.f32.vlgmr.msra.gmra.mxu1 %v3225_v36 }
 0x12f   : > { %v2028_v4 = vpop.f32.mrf.mxu0 }
 0x131   : > { %v338_v5 = vpop.f32.mrf.mxu0 }
 0x137   : > { %v2063_v9 = vpop.f32.mrf.mxu1 }
 0x138   : > { %v506_v26 = vadd.f32 %v2063_v9, %v2028_v4 }
 0x139   : > { %v499_v11 = vpop.f32.mrf.mxu1 }
 0x13a   : > { %v500_v28 = vadd.f32 %v499_v11, %v338_v5 }
 0x150   : > { %v2098_v10 = vpop.f32.mrf.mxu0 }
 0x151   : > { %v617_v29 = vadd.f32 %v2098_v10, %v506_v26  ;;  %v2480_v10 = vld [vmem:[%s2765_s28] sm:$0xff] }
 0x152   : > { %v609_v14 = vpop.f32.mrf.mxu0 }
 0x153   : > { %v610_v34 = vadd.f32 %v609_v14, %v500_v28 }
 0x159   : > { %v2133_v15 = vpop.f32.mrf.mxu1 }
 0x15a   : > { %v714_v37 = vadd.f32 %v2133_v15, %v617_v29 }
 0x15b   : > { %v705_v17 = vpop.f32.mrf.mxu1 }
 0x15c   : > { %v706_v43 = vadd.f32 %v705_v17, %v610_v34 }
 0x172   : > { %v2168_v16 = vpop.f32.mrf.mxu0 }
 0x173   : > { %v839_v45 = vadd.f32 %v2168_v16, %v714_v37 }
 0x174   : > { %v832_v19 = vpop.f32.mrf.mxu0 }
 0x175   : > { %v833_v49 = vadd.f32 %v832_v19, %v706_v43 }
 0x17b   : > { %v2203_v20 = vpop.f32.mrf.mxu1 }
 0x17c   : > { %v932_v52 = vadd.f32 %v2203_v20, %v839_v45 }
 0x17d   : > { %v925_v22 = vpop.f32.mrf.mxu1 }
 0x17e   : > { %v926_v57 = vadd.f32 %v925_v22, %v833_v49  ;;  %v1622_v1 = vmul.f32 0.03125, %v932_v52 }
 0x180   : > { %v1621_v13 = vmul.f32 0.03125, %v926_v57  ;;  %v1626_v41 = vmul.f32 %v1622_v1, %v1622_v1 }
 0x182   : > { %v1625_v59 = vmul.f32 %v1621_v13, %v1621_v13 }
 0x195   : > { %v2238_v21 = vpop.f32.mrf.mxu0 }
 0x197   : > { %v1024_v23 = vpop.f32.mrf.mxu0 }
 0x19d   : > { %v2273_v24 = vpop.f32.mrf.mxu1 }
 0x19e   : > { %v1192_v46 = vadd.f32 %v2273_v24, %v2238_v21 }
 0x19f   : > { %v1185_v33 = vpop.f32.mrf.mxu1 }
 0x1a0   : > { %v1186_v53 = vadd.f32 %v1185_v33, %v1024_v23 }
 0x1b6   : > { %v2308_v27 = vpop.f32.mrf.mxu0 }
 0x1b7   : > { %v1303_v54 = vadd.f32 %v2308_v27, %v1192_v46 }
 0x1b8   : > { %v1295_v39 = vpop.f32.mrf.mxu0 }
 0x1b9   : > { %v1296_v58 = vadd.f32 %v1295_v39, %v1186_v53 }
 0x1bf   : > { %v2343_v42 = vpop.f32.mrf.mxu1 }
 0x1c0   : > { %v1400_v60 = vadd.f32 %v2343_v42, %v1303_v54 }
 0x1c1   : > { %v1391_v55 = vpop.f32.mrf.mxu1 }
 0x1c2   : > { %v1392_v6 = vadd.f32 %v1391_v55, %v1296_v58 }
 0x1d8   : > { %v2378_v47 = vpop.f32.mrf.mxu0 }
 0x1d9   : > { %v1525_v7 = vadd.f32 %v2378_v47, %v1400_v60 }
 0x1da   : > { %v1518_v63 = vpop.f32.mrf.mxu0 }
 0x1db   : > { %v1519_v30 = vadd.f32 %v1518_v63, %v1392_v6 }
 0x1e1   : > { %v2413_v8 = vpop.f32.mrf.mxu1 }
 0x1e2   : > { %v1618_v31 = vadd.f32 %v2413_v8, %v1525_v7 }
 0x1e3   : > { %v1611_v40 = vpop.f32.mrf.mxu1 }
 0x1e4   : > { %v1624_v48 = vmul.f32 0.03125, %v1618_v31  ;;  %v1612_v51 = vadd.f32 %v1611_v40, %v1519_v30 }
 0x1e6   : > { %v1628_v2 = vsub.f32 %v1624_v48, %v1626_v41  ;;  %v1623_v56 = vmul.f32 0.03125, %v1612_v51 }
 0x1e8   : > { %v1630_v50 = vmax.f32 %v1628_v2, 0.0  ;;  %v1627_v35 = vsub.f32 %v1623_v56, %v1625_v59 }
 0x1ea   : > { %v1632_v44 = vadd.f32 1e-06, %v1630_v50  ;;  %v1629_v36 = vmax.f32 %v1627_v35, 0.0 }
 0x1ec   : > { %2475 = vrsqrt.f32 %v1632_v44  ;;  %v1631_v25 = vadd.f32 1e-06, %v1629_v36 }
 0x1ee   : > { %2477 = vrsqrt.f32 %v1631_v25 }
 0x1f9   : > { %v2476_v32 = vpop.eup %2475 }
 0x1fa   : > { %v1644_v0 = vmul.f32 %v2476_v32, %v1769_v18 }
 0x1fb   : > { %v2478_v61 = vpop.eup %2477 }
 0x1fc   : > { %v1648_v12 = vmul.f32 %v1644_v0, %v1622_v1  ;;  %v1643_v38 = vmul.f32 %v2478_v61, %v1769_v18  ;;  %v1646_v4 = vmul.f32 %v2479_v3, %v1644_v0 }
 0x1fe   : > { %v1647_v5 = vmul.f32 %v1643_v38, %v1621_v13  ;;  %v1656_v9 = vsub.f32 %v1770_v62, %v1648_v12  ;;  %v1645_v11 = vmul.f32 %v2480_v10, %v1643_v38 }
 0x200   : > { %v1655_v14 = vsub.f32 %v1770_v62, %v1647_v5  ;;  %v1658_v15 = vadd.f32 %v1656_v9, %v1646_v4 }
 0x202   : > { %v1657_v16 = vadd.f32 %v1655_v14, %v1645_v11  ;;  %1660 = vst [vmem:[%s230_s26 + $0x8] sm:$0xff] %v1658_v15 }
 0x204   : > { %1659 = vst [vmem:[%s230_s26] sm:$0xff] %v1657_v16 }
 0x205   : > { %2548 = shalt.err (!%p2545_p0)
}
 0x206   : > { %s2549_s12 = scalar_lea.hbm %s3439_s11, 256  ;;  %s2553_s23 = scalar_lea.hbm %s3488_s4, 512 }
 0x207   : > { %p2550_p5 = scmp.ne.s32.totalorder %s3439_s11, %s2549_s12  ;;  %p2554_p4 = scmp.lt.s32.totalorder %s3439_s11, %s3488_s4 }
 0x208   : > { %p2555_p6 = scmp.lt.s32.totalorder %s2553_s23, %s2549_s12 }
 0x209   : > { %p2551_p2 = pnand %p2550_p5, %p3554_p11 }
 0x20a   : > { %p2556_p8 = por %p2555_p6, %p2554_p4 }
 0x20b   : > { %p2552_p1 = pneg %p2551_p2 }
 0x20d   : > { %p2557_p3 = pnand %p2556_p8, %p2552_p1 }
 0x20f   : > { %2560 = shalt.err (!%p2557_p3)
}
 0x210   : > { %s2610_s24 = smov 128   ;;  %s2611_s26 = smov 8  }
 0x211   : > { %2420 = dma.vmem_to_hbm [thread:$0]  (%p3554_p11), %s3441_s29, 256, %s3439_s11, %s1662_s19, %s2610_s24, %s2610_s24, %s2611_s26  }
 0x212 PF: > { %s1690_s13 = sand.u32 1, %s2591_s15   ;;  %p3555_p7 = scmp.ne.s32.totalorder %s3516_s22, 0 }
 0x213   : > { %p3556_p9 = scmp.ge.s32.totalorder %s2603_s18, 2  ;;  %s1691_s14 = scalar_lea.sflag [#allocation4], %s1690_s13 }
 0x215   : > { %p2431_p10 = pnand %p3556_p9, %p3555_p7 }
 0x217   : > { %p2432_p12 = pneg %p2431_p10 }
 0x219   : > { %2586 = dma.done.wait (%p2432_p12), %s1691_s14, 256  }
 0x21a   : > { %2588 = vsyncadd (%p2432_p12), %s1691_s14, 4294967040  ;;  %p18_p13 = scmp.ge.s32.totalorder %s2691_s27, 4   ;;  %s3557_s15 = smov %s2595_s16 }
 0x21b   : > { %s3558_s16 = smov %s2599_s17  ;;  %s3559_s17 = smov %s2711_s9 }
 0x21c   : > { %s3560_s18 = smov %s2691_s27  ;;  %20 = sbr.rel (!%p18_p13) target bundleno = 6 (0x6), region = 85 }
 0x221   :  { %1696 = vsyncpa [#allocation3], 1 }
 0x222   :  { %1698 = vsyncpa [#allocation3 + $0x1], 1 }
 0x223   :  { %1699 = vsyncpa [#allocation6], 1 }
 0x224   :  { %1700 = vsyncpa [#allocation4], 1 }
 0x225   :  { %1702 = vsyncpa [#allocation4 + $0x1], 1 }

</bundles_post_ra>
